<compile_context>
chip_gen: v7x
topology: tpu7x:2x2x1
jax: 0.10.0
libtpu: 0.0.40
codegen_flags: <defaults>
</compile_context>

<pallas_src>
import math
from functools import partial

import jax
import jax.numpy as jnp
from jax import lax
from jax.experimental import pallas as pl
from jax.experimental.pallas import tpu as pltpu


def _gal_kernel(x_ref, m_ref, wqkv_ref, bqkv_ref, wf_ref, bf_ref, o_ref,
                *, batch_tile, seq_len, num_heads, head_size, hidden):
    """Fused graph-attention forward for a tile of `batch_tile` batch elements.

    x_ref    : (Bt, S, H)       sequence inputs
    m_ref    : (Bt, S, S) int8  graph mask (nonzero = attend)
    wqkv_ref : (H, 3H)          packed Q|K|V projection weights (in, out)
    bqkv_ref : (1, 3H)          packed Q|K|V biases
    wf_ref   : (H, H)           final projection weight (in, out)
    bf_ref   : (1, H)           final projection bias
    o_ref    : (Bt, S, H)       output
    """
    # Fused QKV projection over all Bt*S rows at once (fills the MXU M dim).
    x2d = x_ref[...].reshape(batch_tile * seq_len, hidden).astype(jnp.float32)
    qkv = (jnp.dot(x2d, wqkv_ref[...].astype(jnp.float32),
                   preferred_element_type=jnp.float32)
           + bqkv_ref[...].astype(jnp.float32))              # (Bt*S, 3H)

    wf = wf_ref[...].astype(jnp.float32)                      # (H, H)
    bf = bf_ref[...].astype(jnp.float32)                      # (1, H)
    scale = 1.0 / math.sqrt(head_size)

    for b in range(batch_tile):                               # static, small
        row0 = b * seq_len
        qkv_b = qkv[row0:row0 + seq_len, :]                   # (S, 3H)

        # Additive mask: 0 where mask != 0, -9e15 otherwise (matches PyTorch).
        add_mask = jnp.where(m_ref[b].astype(jnp.float32) > 0.0,
                             0.0, -9.0e15)                    # (S, S) f32

        out = jnp.zeros((seq_len, hidden), jnp.float32)

        # num_heads is small & static -> unrolled; for many heads a batched
        # einsum over a (nh, S, hd) view would be preferable.
        for h in range(num_heads):
            lo = h * head_size
            qh = qkv_b[:, lo:lo + head_size]                               # (S, hd)
            kh = qkv_b[:, hidden + lo:hidden + lo + head_size]             # (S, hd)
            vh = qkv_b[:, 2 * hidden + lo:2 * hidden + lo + head_size]     # (S, hd)

            # scores = qh @ kh^T without materializing a transpose.
            scores = lax.dot_general(
                qh, kh, (((1,), (1,)), ((), ())),
                preferred_element_type=jnp.float32) * scale   # (S, S)
            scores = scores + add_mask

            # Numerically-stable softmax (f32 throughout).
            scores = scores - jnp.max(scores, axis=-1, keepdims=True)
            p = jnp.exp(scores)
            p = p * pl.reciprocal(jnp.sum(p, axis=-1, keepdims=True),
                                  approx=True)

            # Context for this head, folded straight into the final projection:
            #   ctx[:, lo:hi] @ Wf  ==  (p @ vh) @ Wf[lo:hi, :]
            ctx_h = jnp.dot(p, vh, preferred_element_type=jnp.float32)     # (S, hd)
            out = out + jnp.dot(ctx_h, wf[lo:lo + head_size, :],
                                preferred_element_type=jnp.float32)        # (S, H)

        o_ref[b] = (out + bf).astype(o_ref.dtype)


def graph_attention_layer(seq_inputs, graph_mask, params,
                          *, num_heads, head_size, batch_tile=None):
    """Wrapper calling the fused Pallas kernel, grid over batch tiles."""
    B, S, H = seq_inputs.shape
    assert num_heads * head_size == H

    # Pick a batch tile: largest divisor of B keeping ~<=512 rows per MXU pass.
    if batch_tile is None:
        cap = max(1, 512 // max(S, 1))
        batch_tile = 1
        for bt in range(min(B, cap), 0, -1):
            if B % bt == 0:
                batch_tile = bt
                break
    assert B % batch_tile == 0
    num_tiles = B // batch_tile

    mask_i8 = graph_mask.astype(jnp.int8)                    # (B, S, S)

    wq, bq, wk, bk, wv, bv, wf, bf = params
    wqkv = jnp.concatenate([wq, wk, wv], axis=1)             # (H, 3H)
    bqkv = jnp.concatenate([bq, bk, bv]).reshape(1, 3 * H)   # (1, 3H)
    bf2 = bf.reshape(1, H)

    kernel = partial(_gal_kernel,
                     batch_tile=batch_tile, seq_len=S,
                     num_heads=num_heads, head_size=head_size, hidden=H)

    return pl.pallas_call(
        kernel,
        out_shape=jax.ShapeDtypeStruct((B, S, H), seq_inputs.dtype),
        grid_spec=pltpu.PrefetchScalarGridSpec(
            num_scalar_prefetch=0,
            grid=(num_tiles,),
            in_specs=[
                pl.BlockSpec((batch_tile, S, H), lambda g: (g, 0, 0)),   # x
                pl.BlockSpec((batch_tile, S, S), lambda g: (g, 0, 0)),   # mask
                pl.BlockSpec((H, 3 * H), lambda g: (0, 0)),              # Wqkv
                pl.BlockSpec((1, 3 * H), lambda g: (0, 0)),              # bqkv
                pl.BlockSpec((H, H), lambda g: (0, 0)),                  # Wf
                pl.BlockSpec((1, H), lambda g: (0, 0)),                  # bf
            ],
            out_specs=pl.BlockSpec((batch_tile, S, H), lambda g: (g, 0, 0)),
        ),
        compiler_params=pltpu.CompilerParams(
            dimension_semantics=("parallel",),
            vmem_limit_bytes=32 * 1024 * 1024,
        ),
    )(seq_inputs, mask_i8, wqkv, bqkv, wf, bf2)


def reference_forward(seq_inputs, graph_mask, params, *, num_heads, head_size):
    """Pure-JAX reference mirroring the PyTorch forward (eval mode)."""
    wq, bq, wk, bk, wv, bv, wf, bf = params
    B, S, H = seq_inputs.shape

    def split(x):   # (B, S, H) -> (B, nh, S, hd)
        return x.reshape(B, S, num_heads, head_size).transpose(0, 2, 1, 3)

    q = split(seq_inputs @ wq + bq)
    k = split(seq_inputs @ wk + bk)
    v = split(seq_inputs @ wv + bv)

    scores = jnp.einsum("bhqd,bhkd->bhqk", q, k) / math.sqrt(head_size)
    add_mask = jnp.where(graph_mask, 0.0, -9.0e15)[:, None, :, :]
    probs = jax.nn.softmax(scores + add_mask, axis=-1)
    ctx = jnp.einsum("bhqk,bhkd->bhqd", probs, v)
    ctx = ctx.transpose(0, 2, 1, 3).reshape(B, S, H)
    return ctx @ wf + bf


if __name__ == "__main__":
    # config.hidden_size = 32, config.num_attention_heads = 4
    #   -> num_heads = 2 (half), head_size = 16, all_head_size = 32
    B, S, H = 2, 16, 32
    num_heads, head_size = 2, 16

    key = jax.random.PRNGKey(0)
    keys = jax.random.split(key, 10)

    seq_inputs = jax.random.normal(keys[0], (B, S, H), dtype=jnp.float32)
    graph_mask = jax.random.bernoulli(keys[1], p=0.6, shape=(B, S, S))
    # guarantee at least one valid key per query row (self-loop)
    graph_mask = graph_mask | jnp.eye(S, dtype=bool)[None, :, :]

    def init_linear(kw, kb, fan_in, fan_out):
        bound = 1.0 / math.sqrt(fan_in)
        w = jax.random.uniform(kw, (fan_in, fan_out), jnp.float32, -bound, bound)
        b = jax.random.uniform(kb, (fan_out,), jnp.float32, -bound, bound)
        return w, b

    wq, bq = init_linear(keys[2], keys[3], H, H)
    wk, bk = init_linear(keys[4], keys[5], H, H)
    wv, bv = init_linear(keys[6], keys[7], H, H)
    wf, bf = init_linear(keys[8], keys[9], H, H)
    params = (wq, bq, wk, bk, wv, bv, wf, bf)

    out = graph_attention_layer(seq_inputs, graph_mask, params,
                                num_heads=num_heads, head_size=head_size)
    out = jax.block_until_ready(out)

    ref = reference_forward(seq_inputs, graph_mask, params,
                            num_heads=num_heads, head_size=head_size)
    assert out.shape == (B, S, H)
    # approx reciprocal in the softmax denominator -> slightly looser tolerance
    assert jnp.allclose(out, ref, atol=1e-3, rtol=1e-3), "mismatch vs reference"

    print("KERNEL_OK")
</pallas_src>

<mosaic_0001>
module attributes {stable_mosaic.version = 11 : i64} {
  func.func @_gal_kernel(%arg0: i32, %arg1: memref<2x16x32xf32, #tpu.memory_space<vmem>>, %arg2: memref<2x16x16xi8, #tpu.memory_space<vmem>>, %arg3: memref<32x96xf32, #tpu.memory_space<vmem>>, %arg4: memref<1x96xf32, #tpu.memory_space<vmem>>, %arg5: memref<32x32xf32, #tpu.memory_space<vmem>>, %arg6: memref<1x32xf32, #tpu.memory_space<vmem>>, %arg7: memref<2x16x32xf32, #tpu.memory_space<vmem>>) attributes {dimension_semantics = [#tpu.dimension_semantics<parallel>], iteration_bounds = array<i64: 1>, scalar_prefetch = 0 : i64, scratch_operands = 0 : i64, tpu.core_type = #tpu.core_type<tc>, window_params = [{transform_indices = @transform_0, window_bounds = array<i64: 2, 16, 32>}, {transform_indices = @transform_1, window_bounds = array<i64: 2, 16, 16>}, {pipeline_mode = #tpu.pipeline_mode<synchronous>, transform_indices = @transform_2, window_bounds = array<i64: 32, 96>}, {pipeline_mode = #tpu.pipeline_mode<synchronous>, transform_indices = @transform_3, window_bounds = array<i64: 1, 96>}, {pipeline_mode = #tpu.pipeline_mode<synchronous>, transform_indices = @transform_4, window_bounds = array<i64: 32, 32>}, {pipeline_mode = #tpu.pipeline_mode<synchronous>, transform_indices = @transform_5, window_bounds = array<i64: 1, 32>}, {transform_indices = @transform_6, window_bounds = array<i64: 2, 16, 32>}]} {
    %c0 = arith.constant 0 : index
    %c0_0 = arith.constant 0 : index
    %c0_1 = arith.constant 0 : index
    %0 = vector.load %arg1[%c0, %c0_0, %c0_1] : memref<2x16x32xf32, #tpu.memory_space<vmem>>, vector<2x16x32xf32>
    %1 = vector.shape_cast %0 : vector<2x16x32xf32> to vector<32x32xf32>
    %c0_2 = arith.constant 0 : index
    %c0_3 = arith.constant 0 : index
    %2 = vector.load %arg3[%c0_2, %c0_3] : memref<32x96xf32, #tpu.memory_space<vmem>>, vector<32x96xf32>
    %cst = arith.constant dense<0.000000e+00> : vector<32x96xf32>
    %3 = tpu.matmul %1, %2, %cst {dimension_numbers = #tpu.dot_dimension_numbers<[1], [0], [0], [1], [0, 0, 1, 1], [], []>} : vector<32x32xf32>, vector<32x96xf32>, vector<32x96xf32> -> vector<32x96xf32>
    %c0_4 = arith.constant 0 : index
    %c0_5 = arith.constant 0 : index
    %4 = vector.load %arg4[%c0_4, %c0_5] : memref<1x96xf32, #tpu.memory_space<vmem>>, vector<1x96xf32>
    %5 = vector.broadcast %4 : vector<1x96xf32> to vector<32x96xf32>
    %6 = arith.addf %3, %5 : vector<32x96xf32>
    %c0_6 = arith.constant 0 : index
    %c0_7 = arith.constant 0 : index
    %7 = vector.load %arg5[%c0_6, %c0_7] : memref<32x32xf32, #tpu.memory_space<vmem>>, vector<32x32xf32>
    %c0_8 = arith.constant 0 : index
    %c0_9 = arith.constant 0 : index
    %8 = vector.load %arg6[%c0_8, %c0_9] : memref<1x32xf32, #tpu.memory_space<vmem>>, vector<1x32xf32>
    %9 = vector.extract_strided_slice %6 {offsets = [0, 0], sizes = [16, 96], strides = [1, 1]} : vector<32x96xf32> to vector<16x96xf32>
    %c0_10 = arith.constant 0 : index
    %c0_11 = arith.constant 0 : index
    %c0_12 = arith.constant 0 : index
    %10 = vector.load %arg2[%c0_10, %c0_11, %c0_12] : memref<2x16x16xi8, #tpu.memory_space<vmem>>, vector<1x16x16xi8>
    %11 = vector.shape_cast %10 : vector<1x16x16xi8> to vector<16x16xi8>
    %12 = arith.sitofp %11 : vector<16x16xi8> to vector<16x16xf32>
    %cst_13 = arith.constant 0.000000e+00 : f32
    %13 = vector.broadcast %cst_13 : f32 to vector<16x16xf32>
    %14 = arith.cmpf ogt, %12, %13 : vector<16x16xf32>
    %cst_14 = arith.constant 0.000000e+00 : f32
    %cst_15 = arith.constant -9.000000e+15 : f32
    %15 = vector.broadcast %cst_14 : f32 to vector<16x16xf32>
    %16 = vector.broadcast %cst_15 : f32 to vector<16x16xf32>
    %17 = arith.select %14, %15, %16 : vector<16x16xi1>, vector<16x16xf32>
    %cst_16 = arith.constant 0.000000e+00 : f32
    %18 = vector.broadcast %cst_16 : f32 to vector<16x32xf32>
    %19 = vector.extract_strided_slice %9 {offsets = [0, 0], sizes = [16, 16], strides = [1, 1]} : vector<16x96xf32> to vector<16x16xf32>
    %20 = vector.extract_strided_slice %9 {offsets = [0, 32], sizes = [16, 16], strides = [1, 1]} : vector<16x96xf32> to vector<16x16xf32>
    %21 = vector.extract_strided_slice %9 {offsets = [0, 64], sizes = [16, 16], strides = [1, 1]} : vector<16x96xf32> to vector<16x16xf32>
    %cst_17 = arith.constant dense<0.000000e+00> : vector<16x16xf32>
    %22 = tpu.matmul %19, %20, %cst_17 {dimension_numbers = #tpu.dot_dimension_numbers<[1], [1], [0], [0], [0, 0, 1, 0], [], []>} : vector<16x16xf32>, vector<16x16xf32>, vector<16x16xf32> -> vector<16x16xf32>
    %cst_18 = arith.constant 2.500000e-01 : f32
    %23 = vector.broadcast %cst_18 : f32 to vector<16x16xf32>
    %24 = arith.mulf %22, %23 : vector<16x16xf32>
    %25 = arith.addf %24, %17 : vector<16x16xf32>
    %cst_19 = arith.constant dense<0xFF800000> : vector<16xf32>
    %26 = vector.multi_reduction <maximumf>, %25, %cst_19 [1] : vector<16x16xf32> to vector<16xf32>
    %27 = vector.shape_cast %26 : vector<16xf32> to vector<16x1xf32>
    %28 = vector.broadcast %27 : vector<16x1xf32> to vector<16x16xf32>
    %29 = arith.subf %25, %28 : vector<16x16xf32>
    %30 = math.exp %29 : vector<16x16xf32>
    %cst_20 = arith.constant dense<0.000000e+00> : vector<16xf32>
    %31 = vector.multi_reduction <add>, %30, %cst_20 [1] : vector<16x16xf32> to vector<16xf32>
    %32 = vector.shape_cast %31 : vector<16xf32> to vector<16x1xf32>
    %33 = tpu.reciprocal %32 {approx = true} : vector<16x1xf32> -> vector<16x1xf32>
    %34 = vector.broadcast %33 : vector<16x1xf32> to vector<16x16xf32>
    %35 = arith.mulf %30, %34 : vector<16x16xf32>
    %cst_21 = arith.constant dense<0.000000e+00> : vector<16x16xf32>
    %36 = tpu.matmul %35, %21, %cst_21 {dimension_numbers = #tpu.dot_dimension_numbers<[1], [0], [0], [1], [0, 0, 1, 1], [], []>} : vector<16x16xf32>, vector<16x16xf32>, vector<16x16xf32> -> vector<16x16xf32>
    %37 = vector.extract_strided_slice %7 {offsets = [0, 0], sizes = [16, 32], strides = [1, 1]} : vector<32x32xf32> to vector<16x32xf32>
    %cst_22 = arith.constant dense<0.000000e+00> : vector<16x32xf32>
    %38 = tpu.matmul %36, %37, %cst_22 {dimension_numbers = #tpu.dot_dimension_numbers<[1], [0], [0], [1], [0, 0, 1, 1], [], []>} : vector<16x16xf32>, vector<16x32xf32>, vector<16x32xf32> -> vector<16x32xf32>
    %39 = arith.addf %18, %38 : vector<16x32xf32>
    %40 = vector.extract_strided_slice %9 {offsets = [0, 16], sizes = [16, 16], strides = [1, 1]} : vector<16x96xf32> to vector<16x16xf32>
    %41 = vector.extract_strided_slice %9 {offsets = [0, 48], sizes = [16, 16], strides = [1, 1]} : vector<16x96xf32> to vector<16x16xf32>
    %42 = vector.extract_strided_slice %9 {offsets = [0, 80], sizes = [16, 16], strides = [1, 1]} : vector<16x96xf32> to vector<16x16xf32>
    %cst_23 = arith.constant dense<0.000000e+00> : vector<16x16xf32>
    %43 = tpu.matmul %40, %41, %cst_23 {dimension_numbers = #tpu.dot_dimension_numbers<[1], [1], [0], [0], [0, 0, 1, 0], [], []>} : vector<16x16xf32>, vector<16x16xf32>, vector<16x16xf32> -> vector<16x16xf32>
    %cst_24 = arith.constant 2.500000e-01 : f32
    %44 = vector.broadcast %cst_24 : f32 to vector<16x16xf32>
    %45 = arith.mulf %43, %44 : vector<16x16xf32>
    %46 = arith.addf %45, %17 : vector<16x16xf32>
    %cst_25 = arith.constant dense<0xFF800000> : vector<16xf32>
    %47 = vector.multi_reduction <maximumf>, %46, %cst_25 [1] : vector<16x16xf32> to vector<16xf32>
    %48 = vector.shape_cast %47 : vector<16xf32> to vector<16x1xf32>
    %49 = vector.broadcast %48 : vector<16x1xf32> to vector<16x16xf32>
    %50 = arith.subf %46, %49 : vector<16x16xf32>
    %51 = math.exp %50 : vector<16x16xf32>
    %cst_26 = arith.constant dense<0.000000e+00> : vector<16xf32>
    %52 = vector.multi_reduction <add>, %51, %cst_26 [1] : vector<16x16xf32> to vector<16xf32>
    %53 = vector.shape_cast %52 : vector<16xf32> to vector<16x1xf32>
    %54 = tpu.reciprocal %53 {approx = true} : vector<16x1xf32> -> vector<16x1xf32>
    %55 = vector.broadcast %54 : vector<16x1xf32> to vector<16x16xf32>
    %56 = arith.mulf %51, %55 : vector<16x16xf32>
    %cst_27 = arith.constant dense<0.000000e+00> : vector<16x16xf32>
    %57 = tpu.matmul %56, %42, %cst_27 {dimension_numbers = #tpu.dot_dimension_numbers<[1], [0], [0], [1], [0, 0, 1, 1], [], []>} : vector<16x16xf32>, vector<16x16xf32>, vector<16x16xf32> -> vector<16x16xf32>
    %58 = vector.extract_strided_slice %7 {offsets = [16, 0], sizes = [16, 32], strides = [1, 1]} : vector<32x32xf32> to vector<16x32xf32>
    %cst_28 = arith.constant dense<0.000000e+00> : vector<16x32xf32>
    %59 = tpu.matmul %57, %58, %cst_28 {dimension_numbers = #tpu.dot_dimension_numbers<[1], [0], [0], [1], [0, 0, 1, 1], [], []>} : vector<16x16xf32>, vector<16x32xf32>, vector<16x32xf32> -> vector<16x32xf32>
    %60 = arith.addf %39, %59 : vector<16x32xf32>
    %61 = vector.broadcast %8 : vector<1x32xf32> to vector<16x32xf32>
    %62 = arith.addf %60, %61 : vector<16x32xf32>
    %c0_29 = arith.constant 0 : index
    %c0_30 = arith.constant 0 : index
    %c0_31 = arith.constant 0 : index
    %63 = vector.load %arg7[%c0_29, %c0_30, %c0_31] : memref<2x16x32xf32, #tpu.memory_space<vmem>>, vector<1x16x32xf32>
    %64 = vector.shape_cast %63 : vector<1x16x32xf32> to vector<16x32xf32>
    %65 = vector.shape_cast %62 : vector<16x32xf32> to vector<1x16x32xf32>
    tpu.vector_store %arg7[%c0_29, %c0_30, %c0_31], %65 {strides = array<i32>} : memref<2x16x32xf32, #tpu.memory_space<vmem>>, vector<1x16x32xf32>,
    %66 = vector.extract_strided_slice %6 {offsets = [16, 0], sizes = [16, 96], strides = [1, 1]} : vector<32x96xf32> to vector<16x96xf32>
    %c1 = arith.constant 1 : index
    %c0_32 = arith.constant 0 : index
    %c0_33 = arith.constant 0 : index
    %67 = vector.load %arg2[%c1, %c0_32, %c0_33] : memref<2x16x16xi8, #tpu.memory_space<vmem>>, vector<1x16x16xi8>
    %68 = vector.shape_cast %67 : vector<1x16x16xi8> to vector<16x16xi8>
    %69 = arith.sitofp %68 : vector<16x16xi8> to vector<16x16xf32>
    %cst_34 = arith.constant 0.000000e+00 : f32
    %70 = vector.broadcast %cst_34 : f32 to vector<16x16xf32>
    %71 = arith.cmpf ogt, %69, %70 : vector<16x16xf32>
    %cst_35 = arith.constant 0.000000e+00 : f32
    %cst_36 = arith.constant -9.000000e+15 : f32
    %72 = vector.broadcast %cst_35 : f32 to vector<16x16xf32>
    %73 = vector.broadcast %cst_36 : f32 to vector<16x16xf32>
    %74 = arith.select %71, %72, %73 : vector<16x16xi1>, vector<16x16xf32>
    %cst_37 = arith.constant 0.000000e+00 : f32
    %75 = vector.broadcast %cst_37 : f32 to vector<16x32xf32>
    %76 = vector.extract_strided_slice %66 {offsets = [0, 0], sizes = [16, 16], strides = [1, 1]} : vector<16x96xf32> to vector<16x16xf32>
    %77 = vector.extract_strided_slice %66 {offsets = [0, 32], sizes = [16, 16], strides = [1, 1]} : vector<16x96xf32> to vector<16x16xf32>
    %78 = vector.extract_strided_slice %66 {offsets = [0, 64], sizes = [16, 16], strides = [1, 1]} : vector<16x96xf32> to vector<16x16xf32>
    %cst_38 = arith.constant dense<0.000000e+00> : vector<16x16xf32>
    %79 = tpu.matmul %76, %77, %cst_38 {dimension_numbers = #tpu.dot_dimension_numbers<[1], [1], [0], [0], [0, 0, 1, 0], [], []>} : vector<16x16xf32>, vector<16x16xf32>, vector<16x16xf32> -> vector<16x16xf32>
    %cst_39 = arith.constant 2.500000e-01 : f32
    %80 = vector.broadcast %cst_39 : f32 to vector<16x16xf32>
    %81 = arith.mulf %79, %80 : vector<16x16xf32>
    %82 = arith.addf %81, %74 : vector<16x16xf32>
    %cst_40 = arith.constant dense<0xFF800000> : vector<16xf32>
    %83 = vector.multi_reduction <maximumf>, %82, %cst_40 [1] : vector<16x16xf32> to vector<16xf32>
    %84 = vector.shape_cast %83 : vector<16xf32> to vector<16x1xf32>
    %85 = vector.broadcast %84 : vector<16x1xf32> to vector<16x16xf32>
    %86 = arith.subf %82, %85 : vector<16x16xf32>
    %87 = math.exp %86 : vector<16x16xf32>
    %cst_41 = arith.constant dense<0.000000e+00> : vector<16xf32>
    %88 = vector.multi_reduction <add>, %87, %cst_41 [1] : vector<16x16xf32> to vector<16xf32>
    %89 = vector.shape_cast %88 : vector<16xf32> to vector<16x1xf32>
    %90 = tpu.reciprocal %89 {approx = true} : vector<16x1xf32> -> vector<16x1xf32>
    %91 = vector.broadcast %90 : vector<16x1xf32> to vector<16x16xf32>
    %92 = arith.mulf %87, %91 : vector<16x16xf32>
    %cst_42 = arith.constant dense<0.000000e+00> : vector<16x16xf32>
    %93 = tpu.matmul %92, %78, %cst_42 {dimension_numbers = #tpu.dot_dimension_numbers<[1], [0], [0], [1], [0, 0, 1, 1], [], []>} : vector<16x16xf32>, vector<16x16xf32>, vector<16x16xf32> -> vector<16x16xf32>
    %94 = vector.extract_strided_slice %7 {offsets = [0, 0], sizes = [16, 32], strides = [1, 1]} : vector<32x32xf32> to vector<16x32xf32>
    %cst_43 = arith.constant dense<0.000000e+00> : vector<16x32xf32>
    %95 = tpu.matmul %93, %94, %cst_43 {dimension_numbers = #tpu.dot_dimension_numbers<[1], [0], [0], [1], [0, 0, 1, 1], [], []>} : vector<16x16xf32>, vector<16x32xf32>, vector<16x32xf32> -> vector<16x32xf32>
    %96 = arith.addf %75, %95 : vector<16x32xf32>
    %97 = vector.extract_strided_slice %66 {offsets = [0, 16], sizes = [16, 16], strides = [1, 1]} : vector<16x96xf32> to vector<16x16xf32>
    %98 = vector.extract_strided_slice %66 {offsets = [0, 48], sizes = [16, 16], strides = [1, 1]} : vector<16x96xf32> to vector<16x16xf32>
    %99 = vector.extract_strided_slice %66 {offsets = [0, 80], sizes = [16, 16], strides = [1, 1]} : vector<16x96xf32> to vector<16x16xf32>
    %cst_44 = arith.constant dense<0.000000e+00> : vector<16x16xf32>
    %100 = tpu.matmul %97, %98, %cst_44 {dimension_numbers = #tpu.dot_dimension_numbers<[1], [1], [0], [0], [0, 0, 1, 0], [], []>} : vector<16x16xf32>, vector<16x16xf32>, vector<16x16xf32> -> vector<16x16xf32>
    %cst_45 = arith.constant 2.500000e-01 : f32
    %101 = vector.broadcast %cst_45 : f32 to vector<16x16xf32>
    %102 = arith.mulf %100, %101 : vector<16x16xf32>
    %103 = arith.addf %102, %74 : vector<16x16xf32>
    %cst_46 = arith.constant dense<0xFF800000> : vector<16xf32>
    %104 = vector.multi_reduction <maximumf>, %103, %cst_46 [1] : vector<16x16xf32> to vector<16xf32>
    %105 = vector.shape_cast %104 : vector<16xf32> to vector<16x1xf32>
    %106 = vector.broadcast %105 : vector<16x1xf32> to vector<16x16xf32>
    %107 = arith.subf %103, %106 : vector<16x16xf32>
    %108 = math.exp %107 : vector<16x16xf32>
    %cst_47 = arith.constant dense<0.000000e+00> : vector<16xf32>
    %109 = vector.multi_reduction <add>, %108, %cst_47 [1] : vector<16x16xf32> to vector<16xf32>
    %110 = vector.shape_cast %109 : vector<16xf32> to vector<16x1xf32>
    %111 = tpu.reciprocal %110 {approx = true} : vector<16x1xf32> -> vector<16x1xf32>
    %112 = vector.broadcast %111 : vector<16x1xf32> to vector<16x16xf32>
    %113 = arith.mulf %108, %112 : vector<16x16xf32>
    %cst_48 = arith.constant dense<0.000000e+00> : vector<16x16xf32>
    %114 = tpu.matmul %113, %99, %cst_48 {dimension_numbers = #tpu.dot_dimension_numbers<[1], [0], [0], [1], [0, 0, 1, 1], [], []>} : vector<16x16xf32>, vector<16x16xf32>, vector<16x16xf32> -> vector<16x16xf32>
    %115 = vector.extract_strided_slice %7 {offsets = [16, 0], sizes = [16, 32], strides = [1, 1]} : vector<32x32xf32> to vector<16x32xf32>
    %cst_49 = arith.constant dense<0.000000e+00> : vector<16x32xf32>
    %116 = tpu.matmul %114, %115, %cst_49 {dimension_numbers = #tpu.dot_dimension_numbers<[1], [0], [0], [1], [0, 0, 1, 1], [], []>} : vector<16x16xf32>, vector<16x32xf32>, vector<16x32xf32> -> vector<16x32xf32>
    %117 = arith.addf %96, %116 : vector<16x32xf32>
    %118 = vector.broadcast %8 : vector<1x32xf32> to vector<16x32xf32>
    %119 = arith.addf %117, %118 : vector<16x32xf32>
    %c1_50 = arith.constant 1 : index
    %c0_51 = arith.constant 0 : index
    %c0_52 = arith.constant 0 : index
    %120 = vector.load %arg7[%c1_50, %c0_51, %c0_52] : memref<2x16x32xf32, #tpu.memory_space<vmem>>, vector<1x16x32xf32>
    %121 = vector.shape_cast %120 : vector<1x16x32xf32> to vector<16x32xf32>
    %122 = vector.shape_cast %119 : vector<16x32xf32> to vector<1x16x32xf32>
    tpu.vector_store %arg7[%c1_50, %c0_51, %c0_52], %122 {strides = array<i32>} : memref<2x16x32xf32, #tpu.memory_space<vmem>>, vector<1x16x32xf32>,
    return
  }
  func.func @transform_0(%arg0: i32) -> (i32, i32, i32) {
    %c0_i32 = arith.constant 0 : i32
    %c0_i32_0 = arith.constant 0 : i32
    %c0_i32_1 = arith.constant 0 : i32
    return %arg0, %c0_i32, %c0_i32_0 : i32, i32, i32
  }
  func.func @transform_1(%arg0: i32) -> (i32, i32, i32) {
    %c0_i32 = arith.constant 0 : i32
    %c0_i32_0 = arith.constant 0 : i32
    %c0_i32_1 = arith.constant 0 : i32
    return %arg0, %c0_i32, %c0_i32_0 : i32, i32, i32
  }
  func.func @transform_2(%arg0: i32) -> (i32, i32) {
    %c0_i32 = arith.constant 0 : i32
    %c0_i32_0 = arith.constant 0 : i32
    %c0_i32_1 = arith.constant 0 : i32
    return %c0_i32, %c0_i32_0 : i32, i32
  }
  func.func @transform_3(%arg0: i32) -> (i32, i32) {
    %c0_i32 = arith.constant 0 : i32
    %c0_i32_0 = arith.constant 0 : i32
    %c0_i32_1 = arith.constant 0 : i32
    return %c0_i32, %c0_i32_0 : i32, i32
  }
  func.func @transform_4(%arg0: i32) -> (i32, i32) {
    %c0_i32 = arith.constant 0 : i32
    %c0_i32_0 = arith.constant 0 : i32
    %c0_i32_1 = arith.constant 0 : i32
    return %c0_i32, %c0_i32_0 : i32, i32
  }
  func.func @transform_5(%arg0: i32) -> (i32, i32) {
    %c0_i32 = arith.constant 0 : i32
    %c0_i32_0 = arith.constant 0 : i32
    %c0_i32_1 = arith.constant 0 : i32
    return %c0_i32, %c0_i32_0 : i32, i32
  }
  func.func @transform_6(%arg0: i32) -> (i32, i32, i32) {
    %c0_i32 = arith.constant 0 : i32
    %c0_i32_0 = arith.constant 0 : i32
    %c0_i32_1 = arith.constant 0 : i32
    return %arg0, %c0_i32, %c0_i32_0 : i32, i32, i32
  }
}

</mosaic_0001>

<bundles_post_ra>
// kernel: tpu_custom_call.1
= control target key start
LH: loop header
LB: loop body
LE: loop exit
PB: predicated region body
PF: predicated region fallthrough
CT: control target
= control target key end

     0   :  { %11 = vsyncpa [#allocation3], 0  ;;  %s2138_s0 = inlined_call_operand.hbm [shape: f32[2,16,32], index: 0, kind: input, shape index: {}]   ;;  %s2139_s1 = inlined_call_operand.hbm [shape: s8[2,16,16], index: 1, kind: input, shape index: {}]   ;;  %s2140_s2 = inlined_call_operand.hbm [shape: f32[32,96], index: 2, kind: input, shape index: {}]   ;;  %s2141_s3 = inlined_call_operand.vmem [shape: f32[1,96], index: 3, kind: input, shape index: {}]   ;;  %s2142_s4 = inlined_call_operand.hbm [shape: f32[32,32], index: 4, kind: input, shape index: {}]   ;;  %s2143_s5 = inlined_call_operand.vmem [shape: f32[1,32], index: 5, kind: input, shape index: {}]   ;;  %s2144_s6 = inlined_call_operand.hbm [shape: f32[2,16,32], index: 6, kind: output, shape index: {}]  }
   0x1   :  { %12 = vsyncpa [#allocation6], 0 }
   0x2   :  { %13 = vsyncpa [#allocation9], 0 }
   0x3   :  { %14 = vsyncpa [#allocation4], 0  ;;  %s1862_s21 = smov [#allocation5]   ;;  %s1744_s25 = scalar_lea.hbm %s2139_s1, 128 }
   0x4   :  { %s32_s22 = sshll.u32 %s1862_s21, 4  ;;  %p1745_p0 = scmp.ne.s32.totalorder %s2139_s1, %s1744_s25  ;;  %s33_s22 = int_to_ptr.vmem [resolvable:$true] %s32_s22 }
   0x5   :  { %p1748_p1 = scmp.lt.u32.totalorder %s1744_s25, %s2139_s1 }
   0x7   :  { %p1750_p2 = pnand %p1748_p1, %p1745_p0 }
   0x9   :  { %1753 = shalt.err (!%p1750_p2)
}
   0xa   :  { %s1754_s30 = scalar_lea.vmem %s33_s22, 128  ;;  %p1759_p4 = scmp.lt.s32.totalorder %s33_s22, %s33_s22 }
   0xb   :  { %p1755_p3 = scmp.ne.s32.totalorder %s33_s22, %s1754_s30  ;;  %p1760_p5 = scmp.lt.s32.totalorder %s1754_s30, %s1754_s30 }
   0xd   :  { %p1761_p6 = por %p1760_p5, %p1759_p4 }
   0xf   :  { %p1762_p7 = pnand %p1761_p6, %p1755_p3 }
  0x11   :  { %1765 = shalt.err (!%p1762_p7)
}
  0x12   :  { %s1863_s7 = smov 32   ;;  %s1864_s8 = smov 2  }
  0x13   :  { %38 = dma.hbm_to_vmem [thread:$0]  %s2139_s1, 128, %s33_s22, [#allocation6], %s1863_s7, %s1863_s7, %s1864_s8  }
  0x14   :  { %s1865_s11 = smov [#allocation2]   ;;  %s1766_s15 = scalar_lea.hbm %s2138_s0, 512 }
  0x15   :  { %s20_s12 = sshll.u32 %s1865_s11, 4  ;;  %p1767_p8 = scmp.ne.s32.totalorder %s2138_s0, %s1766_s15  ;;  %s21_s12 = int_to_ptr.vmem [resolvable:$true] %s20_s12 }
  0x16   :  { %p1770_p9 = scmp.lt.u32.totalorder %s1766_s15, %s2138_s0 }
  0x18   :  { %p1772_p10 = pnand %p1770_p9, %p1767_p8 }
  0x1a   :  { %1775 = shalt.err (!%p1772_p10)
}
  0x1b   :  { %s1776_s20 = scalar_lea.vmem %s21_s12, 512  ;;  %p1781_p12 = scmp.lt.s32.totalorder %s21_s12, %s21_s12 }
  0x1c   :  { %p1777_p11 = scmp.ne.s32.totalorder %s21_s12, %s1776_s20  ;;  %p1782_p13 = scmp.lt.s32.totalorder %s1776_s20, %s1776_s20 }
  0x1e   :  { %p1783_p0 = por %p1782_p13, %p1781_p12 }
  0x20   :  { %p1784_p1 = pnand %p1783_p0, %p1777_p11 }
  0x22   :  { %1787 = shalt.err (!%p1784_p1)
}
  0x23   :  { %s1866_s1 = smov 128   ;;  %s1867_s21 = smov 8  }
  0x24   :  { %26 = dma.hbm_to_vmem [thread:$0]  %s2138_s0, 512, %s21_s12, [#allocation3], %s1866_s1, %s1866_s1, %s1867_s21  }
  0x25   :  { %s1868_s24 = smov [#allocation7]   ;;  %s1869_s26 = smov [#allocation8]  }
  0x26   :  { %s44_s25 = sshll.u32 %s1868_s24, 4  ;;  %s58_s27 = sshll.u32 %s1869_s26, 4  ;;  %s45_s25 = int_to_ptr.vmem [resolvable:$true] %s44_s25  ;;  %s1939_s27 = int_to_ptr.vmem [resolvable:$true] %s58_s27 }
  0x27   :  { %s1788_s30 = scalar_lea.hbm %s2140_s2, 512 }
  0x28   :  { %p1789_p2 = scmp.ne.s32.totalorder %s2140_s2, %s1788_s30  ;;  %p1792_p3 = scmp.lt.u32.totalorder %s1788_s30, %s2140_s2 }
  0x2a   :  { %p1794_p4 = pnand %p1792_p3, %p1789_p2 }
  0x2c   :  { %1797 = shalt.err (!%p1794_p4)
}
  0x2d   :  { %s1798_s0 = scalar_lea.vmem %s45_s25, 512  ;;  %p1803_p6 = scmp.lt.s32.totalorder %s45_s25, %s45_s25 }
  0x2e   :  { %p1799_p5 = scmp.ne.s32.totalorder %s45_s25, %s1798_s0  ;;  %p1804_p7 = scmp.lt.s32.totalorder %s1798_s0, %s1798_s0 }
  0x30   :  { %p1805_p8 = por %p1804_p7, %p1803_p6 }
  0x32   :  { %p1806_p9 = pnand %p1805_p8, %p1799_p5 }
  0x34   :  { %1809 = shalt.err (!%p1806_p9)
}
  0x35   :  { %50 = dma.hbm_to_vmem [thread:$0]  %s2140_s2, 512, %s45_s25, [#allocation6], %s1866_s1, %s1866_s1, %s1867_s21  }
  0x36   :  { %s1810_s15 = scalar_lea.hbm %s2142_s4, 512 }
  0x37   :  { %p1811_p10 = scmp.ne.s32.totalorder %s2142_s4, %s1810_s15  ;;  %p1814_p11 = scmp.lt.u32.totalorder %s1810_s15, %s2142_s4 }
  0x39   :  { %p1816_p12 = pnand %p1814_p11, %p1811_p10 }
  0x3b   :  { %1819 = shalt.err (!%p1816_p12)
}
  0x3c   :  { %s1820_s20 = scalar_lea.vmem %s1939_s27, 512  ;;  %p1825_p0 = scmp.lt.s32.totalorder %s1939_s27, %s1939_s27 }
  0x3d   :  { %p1821_p13 = scmp.ne.s32.totalorder %s1939_s27, %s1820_s20  ;;  %p1826_p1 = scmp.lt.s32.totalorder %s1820_s20, %s1820_s20 }
  0x3f   :  { %p1827_p2 = por %p1826_p1, %p1825_p0 }
  0x41   :  { %p1828_p3 = pnand %p1827_p2, %p1821_p13 }
  0x43   :  { %1831 = shalt.err (!%p1828_p3)
}
  0x44   :  { %64 = dma.hbm_to_vmem [thread:$0]  %s2142_s4, 512, %s1939_s27, [#allocation9], %s1866_s1, %s1866_s1, %s1867_s21  }
  0x45   :  { %1854 = dma.done.wait [#allocation3], 512  }
  0x46   :  { %1855 = vsyncadd [#allocation3], 4294966784 }
  0x47   :  { %1856 = dma.done.wait [#allocation6], 640  }
  0x48   :  { %1857 = vsyncadd [#allocation6], 4294966656 }
  0x49   :  { %1858 = dma.done.wait [#allocation9], 512  }
  0x4a   :  { %1859 = vsyncadd [#allocation9], 4294966784  ;;  %vm94_vm0 = vcmask 261120   ;;  %v83_v0 = vld [vmem:[#allocation7] sm:$0xff]  ;;  %v84_v1 = vld [vmem:[#allocation7 + $0x8] sm:$0xff]  ;;  %vm213_vm1 = vcmask 130048  }
  0x4b   :  { %v85_v2 = vld [vmem:[#allocation7 + $0x10] sm:$0xff]  ;;  %v1589_v3 = vpack.c.bf16 %v84_v1, %v83_v0  ;;  %v86_v4 = vld [vmem:[#allocation7 + $0x18] sm:$0xff]  ;;  %v80_v7 = vld [vmem:[#allocation2 + $0x8] sm:$0xff]  ;;  %s1870_s24 = smov 112   ;;  %s1871_s25 = smov 96  }
  0x4c   :  { %v79_v5 = vld [vmem:[#allocation2] sm:$0xff]  ;;  %v1593_v6 = vpack.c.bf16 %v86_v4, %v85_v2  ;;  %v81_v8 = vld [vmem:[#allocation2 + $0x10] sm:$0xff]  ;;  %v82_v9 = vld [vmem:[#allocation2 + $0x18] sm:$0xff]  ;;  %v1873_v35 = vmov -9e+15   ;;  %s1874_s26 = smov 64  }
  0x4d   :  { %1499 = vmatprep.mubr.msk.f32.mxu0 %vm94_vm0, %v79_v5  ;;  %1590 = vmatprep.subr.bf16.mxu0 %v1589_v3  ;;  %v1983_v10 = vld [vmem:[%s2141_s3] ss:$0 sm:$0xff]  ;;  %s1872_s3 = smov 80   ;;  %vm2001_vm2 = vmpackc.low %vm213_vm1, %vm213_vm1  ;;  %s1875_s27 = smov 48  }
  0x4e   :  { %1592 = vmatpush3.bf16.msra.mxu0 %v1589_v3  ;;  %v2015_v29 = vld [vmem:[#allocation5] sm:$0xff]  }
  0x4f   :  { %1594 = vmatprep.subr.bf16.mxu0 %v1593_v6  ;;  %v1430_v30 = vunpack.c.1.s8 %v2015_v29  ;;  %v1429_v31 = vunpack.c.0.s8 %v2015_v29 }
  0x51   :  { %v202_v32 = vcvt.s32.f32 %v1430_v30  ;;  %v201_v33 = vcvt.s32.f32 %v1429_v31  ;;  %v195_v30 = vld [vmem:[#allocation8 + $0x18] sm:$0xff] }
  0x52   :  { %1596 = vmatpush3.bf16.msra.mxu0 %v1593_v6 }
  0x53   :  { %vm204_vm3 = vcmp.gt.f32.partialorder %v202_v32, 0.0  ;;  %vm203_vm4 = vcmp.gt.f32.partialorder %v201_v33, 0.0 }
  0x54   :  { %v206_v36 = vsel %vm204_vm3, 0.0, %v1873_v35  ;;  %v205_v39 = vsel %vm203_vm4, 0.0, %v1873_v35 }
  0x55   :  { %1500 = vmatmul.mubr.msk.f32.vlgmr.msra.gmra.mrb[0].mxu0 %vm94_vm0, %v80_v7 }
  0x56   :  { %1502 = vmatprep.mubr.msk.f32.mxu0 %vm94_vm0, %v81_v8 }
  0x59   :  { %1503 = vmatmul.mubr.msk.f32.gmra.mrb[2].mxu0 %vm94_vm0, %v82_v9 }
 0x128   :  { %v1501_v11 = vpop.f32.mrb[0].mxu0 }
 0x129   :  { %v179_v12 = vadd.f32 %v1501_v11, %v1983_v10  ;;  %v173_v13 = vpop.f32.mrb[1].mxu0 }
 0x12a   :  { %v174_v14 = vadd.f32 %v1983_v10, %v173_v13  ;;  %v193_v13 = vld [vmem:[#allocation8 + $0x8] sm:$0xff] }
 0x12c   :  { %410 = vrot.lane.b32.xlu1 %v174_v14, %s1870_s24  ;;  %1509 = vmatprep.mubr.msk.f32.mxu1 %vm213_vm1, %v174_v14  ;;  %v1989_v15 = vpack.i.bf16 %v179_v12, %v174_v14  ;;  %v1996_v16 = vpop.f32.mrb[2].mxu0 }
 0x12d   :  { %v183_v28 = vpop.f32.mrb[3].mxu0  ;;  %v2031_v9 = vadd.f32 %v1996_v16, %v1983_v10 }
 0x12e   :  { %1673 = vrot.lane.b32.xlu0 %v1989_v15, %s1871_s25  ;;  %v2034_v11 = vadd.f32 %v1983_v10, %v183_v28  ;;  %v192_v10 = vld [vmem:[#allocation8] sm:$0xff]  ;;  %v194_v28 = vld [vmem:[#allocation8 + $0x10] sm:$0xff] }
 0x12f   :  { %v2052_v14 = vpack.c.bf16 %v193_v13, %v192_v10 }
 0x130   :  { %412 = vrot.lane.b32.xlu1 %v179_v12, %s1870_s24 }
 0x132   :  { %1678 = vrot.lane.b32.xlu0 %v1989_v15, %s1872_s3 }
 0x19e   :  { %v411_v17 = vpop.permute.xlu1 %410 }
 0x19f   :  { %1523 = vmatprep.mubr.msk.f32.mxu0 %vm213_vm1, %v411_v17 }
 0x1a0   :  { %v1674_v18 = vpop.permute.xlu0 %1673 }
 0x1a1   :  { %v1676_v19 = vunpack.i.h.bf16 %v1674_v18  ;;  %v1675_v20 = vunpack.i.l.bf16 %v1674_v18 }
 0x1a2   :  { %v413_v27 = vpop.permute.xlu1 %412 }
 0x1a3   :  { %v1597_v22 = vpack.c.bf16 %v1676_v19, %v1675_v20 }
 0x1a4   :  { %v1679_v23 = vpop.permute.xlu0 %1678 }
 0x1a5   :  { %v1681_v24 = vunpack.i.h.bf16 %v1679_v23  ;;  %v1680_v25 = vunpack.i.l.bf16 %v1679_v23  ;;  %1599 = vmatprep.subr.msk.bf16.mxu1 %vm2001_vm2, %v1597_v22 }
 0x1a6   :  { %1602 = vmatpush3.bf16.xpose.msk.msra.mxu1 %vm2001_vm2, %v1597_v22 }
 0x1a7   :  { %v1607_v26 = vpack.c.bf16 %v1681_v24, %v1680_v25 }
 0x1a9   :  { %1609 = vmatprep.subr.msk.bf16.mxu0 %vm2001_vm2, %v1607_v26 }
 0x1aa   :  { %1612 = vmatpush3.bf16.xpose.msk.msra.mxu0 %vm2001_vm2, %v1607_v26 }
 0x1ab   :  { %1622 = vmatprep.subr.bf16.mxu0 %v2052_v14 }
 0x1ad   :  { %1510 = vmatmul.mubr.msk.f32.vlgmr.msra.gmra.mrb[0].mxu1 %vm213_vm1, %v179_v12  ;;  %v2040_v12 = vpack.i.bf16 %v2031_v9, %v2034_v11 }
 0x1b1   :  { %1524 = vmatmul.mubr.msk.f32.vlgmr.msra.gmra.mrb[4].mxu0 %vm213_vm1, %v413_v27 }
 0x1b2   :  { %1624 = vmatpush3.bf16.msra.mxu0 %v2052_v14 }
 0x280   :  { %v1511_v34 = vpop.f32.mrb[0].mxu1 }
 0x281   :  { %v298_v37 = vmul.f32 0.25, %v1511_v34  ;;  %v288_v38 = vpop.f32.mrb[1].mxu1 }
 0x282   :  { %v297_v40 = vmul.f32 0.25, %v288_v38  ;;  %v2057_v38 = vpack.c.bf16 %v195_v30, %v194_v28 }
 0x283   :  { %v300_v41 = vadd.f32 %v298_v37, %v206_v36 }
 0x284   :  { %v1525_v42 = vpop.f32.mrb[4].mxu0  ;;  %v299_v43 = vadd.f32 %v297_v40, %v205_v39 }
 0x285   :  { %v492_v44 = vpop.f32.mrb[5].mxu0  ;;  %v304_v45 = vsel %vm213_vm1, %v300_v41, -inf  ;;  %v502_v46 = vmul.f32 0.25, %v1525_v42 }
 0x286   :  { %v501_v47 = vmul.f32 0.25, %v492_v44  ;;  %305 = vmax.xlane.f32.xlu1 %v304_v45  ;;  %v301_v48 = vsel %vm213_vm1, %v299_v43, -inf }
 0x287   :  { %302 = vmax.xlane.f32.xlu0 %v301_v48  ;;  %v504_v51 = vadd.f32 %v502_v46, %v206_v36 }
 0x288   :  { %v503_v49 = vadd.f32 %v501_v47, %v205_v39 }
 0x289   :  { %v508_v52 = vsel %vm213_vm1, %v504_v51, -inf }
 0x28a   :  { %v505_v50 = vsel %vm213_vm1, %v503_v49, -inf }
 0x28b   :  { %506 = vmax.xlane.f32.xlu0 %v505_v50 }
 0x28f   :  { %509 = vmax.xlane.f32.xlu0 %v508_v52 }
 0x313   :  { %v306_v53 = vpop.xlane.xlu1 %305 }
 0x314   :  { %v308_v54 = vsub.f32 %v300_v41, %v306_v53  ;;  %v303_v55 = vpop.xlane.xlu0 %302 }
 0x315   :  { %v307_v56 = vsub.f32 %v299_v43, %v303_v55 }
 0x316   :  { %v311_v57 = vmul.f32 1.442695, %v308_v54 }
 0x317   :  { %v309_v58 = vmul.f32 1.442695, %v307_v56 }
 0x318   :  { %1712 = vpow2.f32 %v311_v57  ;;  %v507_v59 = vpop.xlane.xlu0 %506  ;;  %v1434_v57 = vunpack.c.3.s8 %v2015_v29 }
 0x319   :  { %1714 = vpow2.f32 %v309_v58  ;;  %v511_v60 = vsub.f32 %v503_v49, %v507_v59  ;;  %v1433_v58 = vunpack.c.2.s8 %v2015_v29  ;;  %v2087_v59 = vld [vmem:[%s2143_s5] ss:$0 sm:$0xff]  ;;  %s1876_s5 = smov [#allocation10]  }
 0x31a   :  { %s1375_s30 = sshll.u32 %s1876_s5, 4  ;;  %s1376_s30 = int_to_ptr.vmem [resolvable:$true] %s1375_s30 }
 0x31b   :  { %v513_v61 = vmul.f32 1.442695, %v511_v60  ;;  %s1832_s7 = scalar_lea.vmem %s1376_s30, 512  ;;  %p1837_p5 = scmp.lt.s32.totalorder %s1376_s30, %s1376_s30 }
 0x31c   :  { %v510_v62 = vpop.xlane.xlu0 %509  ;;  %p1833_p4 = scmp.ne.s32.totalorder %s1376_s30, %s1832_s7  ;;  %p1838_p6 = scmp.lt.s32.totalorder %s1832_s7, %s1832_s7 }
 0x31d   :  { %1716 = vpow2.f32 %v513_v61  ;;  %v512_v63 = vsub.f32 %v504_v51, %v510_v62  ;;  %v792_v62 = vcvt.s32.f32 %v1434_v57 }
 0x31e   :  { %p1839_p7 = por %p1838_p6, %p1837_p5 }
 0x31f   :  { %v515_v0 = vmul.f32 1.442695, %v512_v63  ;;  %vm794_vm5 = vcmp.gt.f32.partialorder %v792_v62, 0.0 }
 0x320   :  { %p1840_p8 = pnand %p1839_p7, %p1833_p4 }
 0x321   :  { %1718 = vpow2.f32 %v515_v0  ;;  %v791_v0 = vcvt.s32.f32 %v1433_v58 }
 0x322   :  { %v1713_v1 = vpop.eup %1712 }
 0x323   :  { %v1715_v2 = vpop.eup %1714  ;;  %v316_v3 = vsel %vm213_vm1, %v1713_v1, 0.0  ;;  %vm793_vm6 = vcmp.gt.f32.partialorder %v791_v0, 0.0 }
 0x324   :  { %317 = vadd.xlane.f32.xlu0 %v316_v3  ;;  %v313_v4 = vsel %vm213_vm1, %v1715_v2, 0.0  ;;  %v796_v3 = vsel %vm794_vm5, 0.0, %v1873_v35 }
 0x325   :  { %314 = vadd.xlane.f32.xlu1 %v313_v4 }
 0x327   :  { %v1717_v5 = vpop.eup %1716 }
 0x328   :  { %v517_v6 = vsel %vm213_vm1, %v1717_v5, 0.0 }
 0x329   :  { %518 = vadd.xlane.f32.xlu1 %v517_v6  ;;  %v795_v6 = vsel %vm793_vm6, 0.0, %v1873_v35 }
 0x32b   :  { %v1719_v7 = vpop.eup %1718 }
 0x32c   :  { %v520_v8 = vsel %vm213_vm1, %v1719_v7, 0.0 }
 0x32d   :  { %521 = vadd.xlane.f32.xlu0 %v520_v8 }
 0x33a   :  { %1683 = vrot.lane.b32.xlu1 %v1989_v15, %s1874_s26 }
 0x33e   :  { %1693 = vrot.lane.b32.xlu1 %v2040_v12, %s1871_s25 }
 0x342   :  { %1698 = vrot.lane.b32.xlu1 %v2040_v12, %s1872_s3 }
 0x343   :  { %1688 = vrot.lane.b32.xlu0 %v1989_v15, %s1875_s27 }
 0x346   :  { %1001 = vrot.lane.b32.xlu1 %v2031_v9, %s1870_s24 }
 0x347   :  { %999 = vrot.lane.b32.xlu0 %v2034_v11, %s1870_s24 }
 0x3b1   :  { %v318_v16 = vpop.xlane.xlu0 %317 }
 0x3b2   :  { %v315_v17 = vpop.xlane.xlu1 %314 }
 0x3b3   :  { %1720 = vrcp.f32 %v315_v17 }
 0x3b4   :  { %1722 = vrcp.f32 %v318_v16 }
 0x3b6   :  { %v519_v18 = vpop.xlane.xlu1 %518 }
 0x3b7   :  { %1724 = vrcp.f32 %v519_v18 }
 0x3ba   :  { %v1684_v15 = vpop.permute.xlu1 %1683  ;;  %v522_v19 = vpop.xlane.xlu0 %521 }
 0x3bb   :  { %v1686_v20 = vunpack.i.h.bf16 %v1684_v15  ;;  %v1685_v22 = vunpack.i.l.bf16 %v1684_v15  ;;  %1726 = vrcp.f32 %v522_v19 }
 0x3bd   :  { %v1721_v23 = vpop.eup %1720  ;;  %v1603_v24 = vpack.c.bf16 %v1686_v20, %v1685_v22 }
 0x3be   :  { %v1723_v25 = vpop.eup %1722  ;;  %v1689_v26 = vpop.permute.xlu0 %1688  ;;  %v321_v27 = vmul.f32 %v1721_v23, %v1715_v2 }
 0x3bf   :  { %v1691_v31 = vunpack.i.h.bf16 %v1689_v26  ;;  %v1690_v32 = vunpack.i.l.bf16 %v1689_v26  ;;  %1604 = vmatprep.subr.bf16.mxu1 %v1603_v24  ;;  %v322_v34 = vmul.f32 %v1723_v25, %v1713_v1  ;;  %v1694_v36 = vpop.permute.xlu1 %1693 }
 0x3c0   :  { %1606 = vmatpush3.bf16.msra.mxu1 %v1603_v24  ;;  %1516 = vmatprep.mubr.msk.f32.mxu1 %vm213_vm1, %v321_v27  ;;  %v1696_v40 = vunpack.i.h.bf16 %v1694_v36  ;;  %v1695_v41 = vunpack.i.l.bf16 %v1694_v36 }
 0x3c1   :  { %v1725_v33 = vpop.eup %1724  ;;  %v1613_v37 = vpack.c.bf16 %v1691_v31, %v1690_v32 }
 0x3c2   :  { %v525_v39 = vmul.f32 %v1725_v33, %v1717_v5  ;;  %v1625_v44 = vpack.c.bf16 %v1696_v40, %v1695_v41  ;;  %v1000_v53 = vpop.permute.xlu0 %999 }
 0x3c3   :  { %1517 = vmatmul.mubr.msk.f32.vlgmr.msra.gmra.mrb[2].mxu1 %vm213_vm1, %v322_v34  ;;  %1614 = vmatprep.subr.bf16.mxu1 %v1613_v37  ;;  %v1699_v46 = vpop.permute.xlu1 %1698 }
 0x3c4   :  { %1616 = vmatpush3.bf16.msra.mxu1 %v1613_v37  ;;  %1530 = vmatprep.mubr.msk.f32.mxu1 %vm213_vm1, %v525_v39  ;;  %v1701_v48 = vunpack.i.h.bf16 %v1699_v46  ;;  %v1700_v49 = vunpack.i.l.bf16 %v1699_v46 }
 0x3c5   :  { %v1727_v42 = vpop.eup %1726  ;;  %1618 = vmatprep.subr.bf16.mxu1 %v2057_v38 }
 0x3c6   :  { %v526_v43 = vmul.f32 %v1727_v42, %v1719_v7  ;;  %v1635_v52 = vpack.c.bf16 %v1701_v48, %v1700_v49 }
 0x3c7   :  { %v1002_v54 = vpop.permute.xlu1 %1001 }
 0x3c8   :  { %1531 = vmatmul.mubr.msk.f32.vlgmr.msra.gmra.mrb[4].mxu1 %vm213_vm1, %v526_v43 }
 0x3c9   :  { %1620 = vmatpush3.bf16.msra.mxu1 %v2057_v38 }
 0x3ca   :  { %1627 = vmatprep.subr.msk.bf16.mxu1 %vm2001_vm2, %v1625_v44 }
 0x496   :  { %v1518_v45 = vpop.f32.mrb[2].mxu1 }
 0x497   :  { %v401_v47 = vpop.f32.mrb[3].mxu1 }
 0x498   :  { %1544 = vmatprep.mubr.msk.f32.mxu0 %vm213_vm1, %v401_v47 }
 0x499   :  { %1545 = vmatmul.mubr.msk.f32.vlgmr.msra.gmra.mrb[6].mxu0 %vm213_vm1, %v1518_v45 }
 0x49b   :  { %v1532_v50 = vpop.f32.mrb[4].mxu1 }
 0x49c   :  { %v605_v51 = vpop.f32.mrb[5].mxu1 }
 0x49d   :  { %1537 = vmatprep.mubr.msk.f32.mxu1 %vm213_vm1, %v605_v51 }
 0x49e   :  { %1538 = vmatmul.mubr.msk.f32.vlgmr.msra.gmra.mrb[6].mxu1 %vm213_vm1, %v1532_v50 }
 0x49f   :  { %1630 = vmatpush3.bf16.xpose.msk.msra.mxu1 %vm2001_vm2, %v1625_v44  ;;  %1551 = vmatprep.mubr.msk.f32.mxu1 %vm213_vm1, %v2034_v11 }
 0x4a0   :  { %1637 = vmatprep.subr.msk.bf16.mxu1 %vm2001_vm2, %v1635_v52 }
 0x4a6   :  { %1552 = vmatmul.mubr.msk.f32.vlgmr.msra.gmra.mrb[8].mxu1 %vm213_vm1, %v2031_v9 }
 0x4a7   :  { %1640 = vmatpush3.bf16.xpose.msk.msra.mxu1 %vm2001_vm2, %v1635_v52  ;;  %1565 = vmatprep.mubr.msk.f32.mxu1 %vm213_vm1, %v1000_v53 }
 0x4ae   :  { %1566 = vmatmul.mubr.msk.f32.vlgmr.msra.gmra.mrb[10].mxu1 %vm213_vm1, %v1002_v54 }
 0x56c   :  { %v1546_v55 = vpop.f32.mrb[6].mxu0 }
 0x56d   :  { %v767_v56 = vpop.f32.mrb[7].mxu0 }
 0x571   :  { %v1539_v60 = vpop.f32.mrb[6].mxu1 }
 0x572   :  { %v773_v61 = vadd.f32 %v1546_v55, %v1539_v60  ;;  %v686_v21 = vpop.f32.mrb[7].mxu1 }
 0x573   :  { %v768_v63 = vadd.f32 %v767_v56, %v686_v21 }
 0x574   :  { %v783_v1 = vadd.f32 %v2087_v59, %v773_v61 }
 0x575   :  { %v782_v2 = vadd.f32 %v2087_v59, %v768_v63 }
 0x576   :  { %785 = vst.msk [vmem:[#allocation10 + $0x8] sm:$0xff] %vm94_vm0, %v783_v1 }
 0x577   :  { %784 = vst.msk [vmem:[#allocation10] sm:$0xff] %vm94_vm0, %v782_v2 }
 0x579   :  { %v1553_v29 = vpop.f32.mrb[8].mxu1 }
 0x57a   :  { %v887_v4 = vmul.f32 0.25, %v1553_v29  ;;  %v877_v5 = vpop.f32.mrb[9].mxu1 }
 0x57b   :  { %v886_v7 = vmul.f32 0.25, %v877_v5 }
 0x57c   :  { %v889_v8 = vadd.f32 %v887_v4, %v796_v3 }
 0x57d   :  { %v888_v9 = vadd.f32 %v886_v7, %v795_v6 }
 0x57e   :  { %v893_v11 = vsel %vm213_vm1, %v889_v8, -inf }
 0x57f   :  { %894 = vmax.xlane.f32.xlu1 %v893_v11  ;;  %v890_v10 = vsel %vm213_vm1, %v888_v9, -inf }
 0x580   :  { %891 = vmax.xlane.f32.xlu0 %v890_v10 }
 0x581   :  { %v1567_v13 = vpop.f32.mrb[10].mxu1 }
 0x582   :  { %v1081_v16 = vpop.f32.mrb[11].mxu1  ;;  %v1091_v17 = vmul.f32 0.25, %v1567_v13 }
 0x583   :  { %v1090_v18 = vmul.f32 0.25, %v1081_v16 }
 0x584   :  { %v1093_v20 = vadd.f32 %v1091_v17, %v796_v3 }
 0x585   :  { %v1092_v15 = vadd.f32 %v1090_v18, %v795_v6 }
 0x586   :  { %v1097_v35 = vsel %vm213_vm1, %v1093_v20, -inf }
 0x587   :  { %v1094_v19 = vsel %vm213_vm1, %v1092_v15, -inf }
 0x588   :  { %1095 = vmax.xlane.f32.xlu0 %v1094_v19 }
 0x58c   :  { %1098 = vmax.xlane.f32.xlu0 %v1097_v35 }
 0x60c   :  { %v895_v22 = vpop.xlane.xlu1 %894 }
 0x60d   :  { %v897_v23 = vsub.f32 %v889_v8, %v895_v22  ;;  %v892_v24 = vpop.xlane.xlu0 %891 }
 0x60e   :  { %v896_v25 = vsub.f32 %v888_v9, %v892_v24 }
 0x60f   :  { %v900_v26 = vmul.f32 1.442695, %v897_v23 }
 0x610   :  { %v898_v27 = vmul.f32 1.442695, %v896_v25 }
 0x611   :  { %1728 = vpow2.f32 %v900_v26 }
 0x612   :  { %1730 = vpow2.f32 %v898_v27 }
 0x615   :  { %v1096_v28 = vpop.xlane.xlu0 %1095 }
 0x616   :  { %v1100_v30 = vsub.f32 %v1092_v15, %v1096_v28 }
 0x618   :  { %v1102_v31 = vmul.f32 1.442695, %v1100_v30 }
 0x619   :  { %v1099_v32 = vpop.xlane.xlu0 %1098 }
 0x61a   :  { %1732 = vpow2.f32 %v1102_v31  ;;  %v1101_v33 = vsub.f32 %v1093_v20, %v1099_v32 }
 0x61b   :  { %v1729_v34 = vpop.eup %1728 }
 0x61c   :  { %v1731_v36 = vpop.eup %1730  ;;  %v1104_v37 = vmul.f32 1.442695, %v1101_v33  ;;  %v905_v39 = vsel %vm213_vm1, %v1729_v34, 0.0 }
 0x61d   :  { %906 = vadd.xlane.f32.xlu0 %v905_v39  ;;  %v902_v40 = vsel %vm213_vm1, %v1731_v36, 0.0 }
 0x61e   :  { %1734 = vpow2.f32 %v1104_v37  ;;  %903 = vadd.xlane.f32.xlu1 %v902_v40 }
 0x624   :  { %v1733_v41 = vpop.eup %1732 }
 0x625   :  { %v1106_v42 = vsel %vm213_vm1, %v1733_v41, 0.0 }
 0x626   :  { %1107 = vadd.xlane.f32.xlu1 %v1106_v42 }
 0x628   :  { %v1735_v43 = vpop.eup %1734 }
 0x629   :  { %v1109_v44 = vsel %vm213_vm1, %v1735_v43, 0.0 }
 0x62a   :  { %1110 = vadd.xlane.f32.xlu0 %v1109_v44 }
 0x637   :  { %1703 = vrot.lane.b32.xlu1 %v2040_v12, %s1874_s26 }
 0x640   :  { %1708 = vrot.lane.b32.xlu0 %v2040_v12, %s1875_s27 }
 0x6aa   :  { %v907_v46 = vpop.xlane.xlu0 %906 }
 0x6ab   :  { %v904_v45 = vpop.xlane.xlu1 %903 }
 0x6ac   :  { %1736 = vrcp.f32 %v904_v45 }
 0x6ad   :  { %1738 = vrcp.f32 %v907_v46 }
 0x6b3   :  { %v1108_v47 = vpop.xlane.xlu1 %1107 }
 0x6b4   :  { %1740 = vrcp.f32 %v1108_v47 }
 0x6b6   :  { %v1737_v48 = vpop.eup %1736 }
 0x6b7   :  { %v1704_v49 = vpop.permute.xlu1 %1703  ;;  %v1111_v50 = vpop.xlane.xlu0 %1110  ;;  %v910_v51 = vmul.f32 %v1737_v48, %v1731_v36 }
 0x6b8   :  { %v1706_v52 = vunpack.i.h.bf16 %v1704_v49  ;;  %v1705_v53 = vunpack.i.l.bf16 %v1704_v49  ;;  %1742 = vrcp.f32 %v1111_v50  ;;  %v1739_v55 = vpop.eup %1738 }
 0x6b9   :  { %1558 = vmatprep.mubr.msk.f32.mxu0 %vm213_vm1, %v910_v51  ;;  %v911_v60 = vmul.f32 %v1739_v55, %v1729_v34 }
 0x6ba   :  { %v1631_v54 = vpack.c.bf16 %v1706_v52, %v1705_v53 }
 0x6bb   :  { %v1709_v56 = vpop.permute.xlu0 %1708 }
 0x6bc   :  { %v1711_v57 = vunpack.i.h.bf16 %v1709_v56  ;;  %v1710_v12 = vunpack.i.l.bf16 %v1709_v56  ;;  %1632 = vmatprep.subr.bf16.mxu0 %v1631_v54 }
 0x6bd   :  { %1634 = vmatpush3.bf16.msra.mxu0 %v1631_v54 }
 0x6be   :  { %v1741_v58 = vpop.eup %1740  ;;  %v1641_v61 = vpack.c.bf16 %v1711_v57, %v1710_v12 }
 0x6bf   :  { %v1114_v21 = vmul.f32 %v1741_v58, %v1733_v41 }
 0x6c0   :  { %1559 = vmatmul.mubr.msk.f32.vlgmr.msra.gmra.mrb[8].mxu0 %vm213_vm1, %v911_v60  ;;  %1642 = vmatprep.subr.bf16.mxu0 %v1641_v61 }
 0x6c1   :  { %1644 = vmatpush3.bf16.msra.mxu0 %v1641_v61  ;;  %1572 = vmatprep.mubr.msk.f32.mxu0 %vm213_vm1, %v1114_v21 }
 0x6c2   :  { %v1743_v62 = vpop.eup %1742  ;;  %1646 = vmatprep.subr.bf16.mxu0 %v2057_v38 }
 0x6c3   :  { %v1115_v63 = vmul.f32 %v1743_v62, %v1735_v43 }
 0x6c5   :  { %1573 = vmatmul.mubr.msk.f32.vlgmr.msra.gmra.mrb[10].mxu0 %vm213_vm1, %v1115_v63 }
 0x6c6   :  { %1648 = vmatpush3.bf16.msra.mxu0 %v2057_v38 }
 0x6c7   :  { %1650 = vmatprep.subr.bf16.mxu0 %v2052_v14 }
 0x793   :  { %v1560_v0 = vpop.f32.mrb[8].mxu0 }
 0x794   :  { %v990_v1 = vpop.f32.mrb[9].mxu0 }
 0x798   :  { %v1574_v2 = vpop.f32.mrb[10].mxu0 }
 0x799   :  { %v1194_v29 = vpop.f32.mrb[11].mxu0 }
 0x79a   :  { %1579 = vmatprep.mubr.msk.f32.mxu0 %vm213_vm1, %v1194_v29 }
 0x79b   :  { %1580 = vmatmul.mubr.msk.f32.vlgmr.msra.gmra.mrb[12].mxu0 %vm213_vm1, %v1574_v2 }
 0x79c   :  { %1652 = vmatpush3.bf16.msra.mxu0 %v2052_v14  ;;  %1586 = vmatprep.mubr.msk.f32.mxu0 %vm213_vm1, %v990_v1 }
 0x7a3   :  { %1587 = vmatmul.mubr.msk.f32.vlgmr.msra.gmra.mrb[12].mxu0 %vm213_vm1, %v1560_v0 }
 0x876   :  { %v1588_v3 = vpop.f32.mrb[12].mxu0 }
 0x877   :  { %v1366_v38 = vadd.f32 %v1588_v3, %v2087_v59  ;;  %v1356_v4 = vpop.f32.mrb[13].mxu0 }
 0x878   :  { %v1365_v5 = vadd.f32 %v2087_v59, %v1356_v4 }
 0x879   :  { %1369 = vst.msk [vmem:[#allocation10 + $0x18] sm:$0xff] %vm94_vm0, %v1366_v38 }
 0x87a   :  { %1368 = vst.msk [vmem:[#allocation10 + $0x10] sm:$0xff] %vm94_vm0, %v1365_v5 }
 0x87b   :  { %1843 = shalt.err (!%p1840_p8)
}
 0x87c   :  { %s1844_s10 = scalar_lea.hbm %s2144_s6, 512 }
 0x87d   :  { %p1845_p9 = scmp.ne.s32.totalorder %s2144_s6, %s1844_s10  ;;  %p1848_p10 = scmp.lt.u32.totalorder %s1844_s10, %s2144_s6 }
 0x87f   :  { %p1850_p11 = pnand %p1848_p10, %p1845_p9 }
 0x881   :  { %1853 = shalt.err (!%p1850_p11)
}
 0x882   :  { %1381 = dma.vmem_to_hbm [thread:$0]  %s1376_s30, 512, %s2144_s6, [#allocation4], %s1866_s1, %s1866_s1, %s1867_s21  }
 0x883   :  { %1860 = dma.done.wait [#allocation4], 512  }
 0x884   :  { %1861 = vsyncadd [#allocation4], 4294966784 }
 0x885   :  { %1385 = vsyncpa [#allocation3], 1 }
 0x886   :  { %1386 = vsyncpa [#allocation6], 1 }
 0x887   :  { %1387 = vsyncpa [#allocation9], 1 }
 0x888   :  { %1388 = vsyncpa [#allocation4], 1 }

</bundles_post_ra>
